<compile_context>
chip_gen: v5e
topology: v5e:2x2
jax: 0.10.0
libtpu: 0.0.40
codegen_flags: <defaults>
</compile_context>

<pallas_src>
import jax
import jax.numpy as jnp
from jax.experimental import pallas as pl
from jax.experimental.pallas import tpu as pltpu


# Budget for the *double-buffered* x tile (2 buffers). Kept small so the
# kernel fits comfortably on every generation (v5e's 16 MiB default scoped
# VMEM, v7x's 64 MiB physical VMEM) with headroom for the output buffers.
_X_TILE_VMEM_BUDGET_BYTES = 8 * 1024 * 1024


def _round_up(x, m):
    return ((x + m - 1) // m) * m


def _choose_tile_b(batch, dim):
    """Largest batch tile (multiple of 8 sublanes) whose double-buffered
    (tile_b, dim) f32 block stays under the VMEM budget."""
    tile_b = min(1024, _round_up(batch, 8))
    tile_b = max(8, _round_up(tile_b, 8))
    while tile_b > 8 and 2 * tile_b * dim * 4 > _X_TILE_VMEM_BUDGET_BYTES:
        tile_b = max(8, _round_up(tile_b // 2, 8))
    return tile_b


def _make_kernel(apply_sigmoid):
    def kernel(x_ref, w_ref, b_ref, o_ref):
        # x_ref: (TILE_B, D) f32 in VMEM   (streamed, double-buffered)
        # w_ref: (1, D)      f32 in VMEM   (lane-dense weight row)
        # b_ref: (1, 1)      f32 in SMEM   (scalar bias)
        # o_ref: (TILE_B, 1) f32 in VMEM
        x = x_ref[...]
        w = w_ref[...]
        b = b_ref[0, 0]
        # VPU multiply (broadcast over sublanes) + XLU lane reduce; no MXU.
        acc = jnp.sum(x * w, axis=-1, keepdims=True)  # (TILE_B, 1) f32
        acc = acc + b
        if apply_sigmoid:
            # Fused sigmoid: exp + reciprocal -> EUP slot (free when mem-bound).
            acc = 1.0 / (1.0 + jnp.exp(-acc))
        o_ref[...] = acc.astype(o_ref.dtype)

    return kernel


def _loglinear_pallas(x, w, b, *, apply_sigmoid, tile_b=None):
    x = jnp.asarray(x, jnp.float32)
    batch, dim = x.shape
    # Accept (D,), (D, 1) or (1, D); present the weight lane-dense as (1, D).
    w = jnp.asarray(w, jnp.float32).reshape(1, dim)
    b = jnp.asarray(b, jnp.float32).reshape(1, 1)

    if tile_b is None:
        tile_b = _choose_tile_b(batch, dim)
    tile_b = max(8, _round_up(int(tile_b), 8))

    # Pad the batch so it tiles exactly; padded rows are sliced off afterwards.
    batch_pad = _round_up(batch, tile_b)
    if batch_pad != batch:
        x = jnp.pad(x, ((0, batch_pad - batch), (0, 0)))

    grid = (batch_pad // tile_b,)

    out = pl.pallas_call(
        _make_kernel(apply_sigmoid),
        out_shape=jax.ShapeDtypeStruct((batch_pad, 1), jnp.float32),
        grid_spec=pltpu.PrefetchScalarGridSpec(
            num_scalar_prefetch=0,
            grid=grid,
            in_specs=[
                # Streamed, auto double-buffered batch tiles of x.
                pl.BlockSpec((tile_b, dim), lambda i: (i, 0)),
                # Lane-dense weight row, same block every step.
                pl.BlockSpec((1, dim), lambda i: (0, 0)),
                # Bias as a scalar in SMEM (no VMEM tile, no pipeline slot).
                pl.BlockSpec(memory_space=pltpu.MemorySpace.SMEM),
            ],
            out_specs=pl.BlockSpec((tile_b, 1), lambda i: (i, 0)),
        ),
        compiler_params=pltpu.CompilerParams(
            # Independent batch tiles -> shard the grid across TCs (v7x).
            dimension_semantics=("parallel",),
            vmem_limit_bytes=32 * 1024 * 1024,
        ),
    )(x, w, b)

    return out[:batch]


def loglinear_forward(x, w, b, *, tile_b=None):
    """Matches LogLinear.forward: x @ W + b, output (B, 1) float32."""
    return _loglinear_pallas(x, w, b, apply_sigmoid=False, tile_b=tile_b)


def loglinear_predict(x, w, b, *, tile_b=None):
    """Matches LogLinear.predict: sigmoid fused inside the kernel."""
    return _loglinear_pallas(x, w, b, apply_sigmoid=True, tile_b=tile_b)


if __name__ == "__main__":
    key = jax.random.PRNGKey(0)
    kx, kw, kb = jax.random.split(key, 3)

    # Small shapes consistent with the module.
    batch = 8
    embedding_dim = 32
    bound = 1.0 / (embedding_dim ** 0.5)  # nn.Linear-style uniform init bound

    x = jax.random.normal(kx, (batch, embedding_dim), dtype=jnp.float32)
    w = jax.random.uniform(kw, (embedding_dim, 1), jnp.float32, -bound, bound)
    b = jax.random.uniform(kb, (1, 1), jnp.float32, -bound, bound)

    out = jax.block_until_ready(loglinear_forward(x, w, b))
    ref = x @ w + b
    assert out.shape == (batch, 1)
    assert jnp.allclose(out, ref, atol=1e-5, rtol=1e-5)

    pred = jax.block_until_ready(loglinear_predict(x, w, b))
    assert jnp.allclose(pred, jax.nn.sigmoid(ref), atol=1e-5, rtol=1e-5)

    # Larger ragged batch: exercises the tiled grid (>1 step), the batch
    # padding path, and the double-buffered pipeline.
    batch2 = 300
    x2 = jax.random.normal(kx, (batch2, embedding_dim), dtype=jnp.float32)
    out2 = jax.block_until_ready(loglinear_forward(x2, w, b, tile_b=128))
    ref2 = x2 @ w + b
    assert out2.shape == (batch2, 1)
    assert jnp.allclose(out2, ref2, atol=1e-5, rtol=1e-5)

    pred2 = jax.block_until_ready(loglinear_predict(x2, w, b, tile_b=128))
    assert jnp.allclose(pred2, jax.nn.sigmoid(ref2), atol=1e-5, rtol=1e-5)

    print("KERNEL_OK")
</pallas_src>

<mosaic_0001>
module attributes {stable_mosaic.version = 11 : i64} {
  func.func @kernel(%arg0: i32, %arg1: memref<8x32xf32, #tpu.memory_space<vmem>>, %arg2: memref<1x32xf32, #tpu.memory_space<vmem>>, %arg3: memref<1x1xf32, #tpu.memory_space<smem>>, %arg4: memref<8x1xf32, #tpu.memory_space<vmem>>) attributes {dimension_semantics = [#tpu.dimension_semantics<parallel>], iteration_bounds = array<i64: 1>, scalar_prefetch = 0 : i64, scratch_operands = 0 : i64, tpu.core_type = #tpu.core_type<tc>, window_params = [{transform_indices = @transform_0, window_bounds = array<i64: 8, 32>}, {pipeline_mode = #tpu.pipeline_mode<synchronous>, transform_indices = @transform_1, window_bounds = array<i64: 1, 32>}, {transform_indices = @transform_2, window_bounds = array<i64: 1, 1>}, {transform_indices = @transform_3, window_bounds = array<i64: 8, 1>}]} {
    %c0 = arith.constant 0 : index
    %c0_0 = arith.constant 0 : index
    %0 = vector.load %arg1[%c0, %c0_0] : memref<8x32xf32, #tpu.memory_space<vmem>>, vector<8x32xf32>
    %c0_1 = arith.constant 0 : index
    %c0_2 = arith.constant 0 : index
    %1 = vector.load %arg2[%c0_1, %c0_2] : memref<1x32xf32, #tpu.memory_space<vmem>>, vector<1x32xf32>
    %c0_3 = arith.constant 0 : index
    %c0_4 = arith.constant 0 : index
    %2 = memref.load %arg3[%c0_3, %c0_4] : memref<1x1xf32, #tpu.memory_space<smem>>
    %3 = vector.broadcast %1 : vector<1x32xf32> to vector<8x32xf32>
    %4 = arith.mulf %0, %3 : vector<8x32xf32>
    %cst = arith.constant dense<0.000000e+00> : vector<8xf32>
    %5 = vector.multi_reduction <add>, %4, %cst [1] : vector<8x32xf32> to vector<8xf32>
    %6 = vector.shape_cast %5 : vector<8xf32> to vector<8x1xf32>
    %7 = vector.broadcast %2 : f32 to vector<8x1xf32>
    %8 = arith.addf %6, %7 : vector<8x1xf32>
    %c0_5 = arith.constant 0 : index
    %c0_6 = arith.constant 0 : index
    %9 = vector.load %arg4[%c0_5, %c0_6] : memref<8x1xf32, #tpu.memory_space<vmem>>, vector<8x1xf32>
    tpu.vector_store %arg4[%c0_5, %c0_6], %8 {strides = array<i32>} : memref<8x1xf32, #tpu.memory_space<vmem>>, vector<8x1xf32>,
    return
  }
  func.func @transform_0(%arg0: i32) -> (i32, i32) {
    %c0_i32 = arith.constant 0 : i32
    %c0_i32_0 = arith.constant 0 : i32
    return %arg0, %c0_i32 : i32, i32
  }
  func.func @transform_1(%arg0: i32) -> (i32, i32) {
    %c0_i32 = arith.constant 0 : i32
    %c0_i32_0 = arith.constant 0 : i32
    %c0_i32_1 = arith.constant 0 : i32
    return %c0_i32, %c0_i32_0 : i32, i32
  }
  func.func @transform_2(%arg0: i32) -> (i32, i32) {
    %c0_i32 = arith.constant 0 : i32
    %c0_i32_0 = arith.constant 0 : i32
    %c0_i32_1 = arith.constant 0 : i32
    return %c0_i32, %c0_i32_0 : i32, i32
  }
  func.func @transform_3(%arg0: i32) -> (i32, i32) {
    %c0_i32 = arith.constant 0 : i32
    %c0_i32_0 = arith.constant 0 : i32
    return %arg0, %c0_i32 : i32, i32
  }
}

</mosaic_0001>

<bundles_post_ra>
// kernel: tpu_custom_call.1
= control target key start
LH: loop header
LB: loop body
LE: loop exit
PB: predicated region body
PF: predicated region fallthrough
CT: control target
= control target key end

     0   :  { %9 = vsyncpa [#allocation4], 0  ;;  %s77_s15 = smov [#allocation3]   ;;  %s110_s0 = inlined_call_operand.hbm [shape: f32[8,32], index: 0, kind: input, shape index: {}]   ;;  %s111_s1 = inlined_call_operand.vmem [shape: f32[1,32], index: 1, kind: input, shape index: {}]   ;;  %s112_s2 = inlined_call_operand.<no memory space> [shape: f32[1,1], index: 2, kind: input, shape index: {}]   ;;  %s113_s3 = inlined_call_operand.vmem [shape: f32[8,1], index: 3, kind: output, shape index: {}]  }
   0x1   :  { %s15_s14 = sshll.u32 %s110_s0, 4  ;;  %s17_s16 = sshll.u32 %s77_s15, 4  ;;  %s16_s14 = int_to_ptr.hbm [resolvable:$true] %s15_s14  ;;  %s18_s16 = int_to_ptr.vmem [resolvable:$true] %s17_s16 }
   0x2   :  { %20 = dma.hbm_to_vmem [thread:$0]  %s16_s14, 128, %s18_s16, [#allocation4]  }
   0x3   :  { %75 = dma.done.wait [#allocation4], 128  }
   0x4   :  { %76 = vsyncadd [#allocation4], 4294967168  ;;  %v29_v0 = vld [vmem:[#allocation3] sm:$0xff]  ;;  %vm36_vm0 = vcmask 261120   ;;  %v40_v4 = vstv %s112_s2  ;;  %vm42_vm1 = vcmask 7168  }
   0x5   :  { %v50_v1 = vld [vmem:[%s111_s1] ss:$0 sm:$0xff] }
   0x6   :  { %v35_v2 = vmul.f32 %v50_v1, %v29_v0 }
   0x8   :  { %v37_v3 = vsel %vm36_vm0, %v35_v2, 0.0 }
   0x9   :  { %38 = vadd.xlane.f32.xlu0 %v37_v3 }
  0x7c   :  { %v39_v5 = vpop.xlane.xlu0 %38 }
  0x7d   :  { %v41_v6 = vadd.f32 %v40_v4, %v39_v5 }
  0x7f   :  { %43 = vst.msk [vmem:[%s113_s3] sm:$0xff] %vm42_vm1, %v41_v6 }
  0x80   :  { %48 = vsyncpa [#allocation4], 1 }

</bundles_post_ra>
